<compile_context>
chip_gen: v6e
topology: v6e:2x2x1
jax: 0.10.0
libtpu: 0.0.40
codegen_flags: <defaults>
</compile_context>

<pallas_src>
import jax
import jax.numpy as jnp
import numpy as np
from jax import lax
from jax.experimental import pallas as pl
from jax.experimental.pallas import tpu as pltpu


# ---------------------------------------------------------------------------
# In-kernel helpers (traced inside the Pallas body)
# ---------------------------------------------------------------------------
def _eye(n, dtype):
    r = lax.broadcasted_iota(jnp.int32, (n, n), 0)
    c = lax.broadcasted_iota(jnp.int32, (n, n), 1)
    return (r == c).astype(dtype)


def _mean_cosine(num, na2, nb2, inv_rows):
    # mean_i  num_i / max(sqrt(na2_i * nb2_i), 1e-8)   -> (1, 1)
    den = jnp.maximum(jnp.sqrt(na2 * nb2), 1e-8)
    cos = num * pl.reciprocal(den, approx=True)
    return jnp.sum(cos, axis=0, keepdims=True) * inv_rows


def _self_graph(proj_col, adj_b):
    # distance(A[i]-A[j]) = sigmoid(w.(A[i]-A[j]) + b); Linear is rank-1 so the
    # single projection proj = A.w is reused for both the row and column terms.
    g = jax.nn.sigmoid((proj_col + adj_b) - proj_col.T)
    I = _eye(g.shape[0], g.dtype)
    return g * (1.0 - I) + I        # force unit diagonal (square at all call sites)


# ---------------------------------------------------------------------------
# Pallas kernel: whole forward hot path in one invocation (fits VMEM easily)
# ---------------------------------------------------------------------------
def _metagraph_kernel(scale_ref, protos_ref, meta_ref, buf_ref,
                      adjw_ref, adjb_ref, W_ref, gcnb_ref,
                      rep_ref, corr_ref):
    protos = protos_ref[...]        # (m, D) f32
    meta = meta_ref[...]            # (n, D) f32
    buf = buf_ref[...]              # (n, D) f32
    adj_w = adjw_ref[...]           # (1, D) f32
    adj_b = adjb_ref[...]           # (1, 1) f32
    W = W_ref[...]                  # (D, D) f32
    gcn_b = gcnb_ref[...]           # (1, D) f32
    scale = scale_ref[0, 0]         # SMEM scalar: -1 / (2 * sigma)

    m = protos.shape[0]
    n = meta.shape[0]

    # --- squared norms, hoisted and reused (dist + cosine denominators) ------
    xx = jnp.sum(protos * protos, axis=1, keepdims=True)            # (m, 1)
    yy = jnp.sum(meta * meta, axis=1, keepdims=True)                # (n, 1)

    # --- correlation_meta = mean cosine(buffer, meta_vertex) -----------------
    cm = _mean_cosine(jnp.sum(buf * meta, axis=1, keepdims=True),
                      jnp.sum(buf * buf, axis=1, keepdims=True),
                      yy, 1.0 / n)

    # --- meta / proto graphs: rank-1 projections on the VPU ------------------
    proj_meta = jnp.sum(meta * adj_w, axis=1, keepdims=True)        # (n, 1)
    proj_prot = jnp.sum(protos * adj_w, axis=1, keepdims=True)      # (m, 1)
    meta_graph = _self_graph(proj_meta, adj_b)                      # (n, n)
    proto_graph = _self_graph(proj_prot, adj_b)                     # (m, m)

    # --- cross graph: dim-0 softmax of -clamp(||p_i - v_j||^2, 1e-6)/(2σ) ----
    pm = lax.dot_general(protos, meta, (((1,), (1,)), ((), ())),
                         preferred_element_type=jnp.float32)        # (m, n)
    dist = jnp.maximum(xx + yy.T - 2.0 * pm, 1e-6)
    logits = dist * scale
    mx = jnp.max(logits, axis=0, keepdims=True)
    e = jnp.exp(logits - mx)
    cross = e * pl.reciprocal(jnp.sum(e, axis=0, keepdims=True), approx=True)

    # --- GraphConvolution (eval mode) in blocked form: adj never materialized
    # adj = [[pg, cross], [cross^T, mg]] + I ; out = D^-1 adj @ (feat W) + b
    # TODO(synk): Dropout(p=0.6) of GraphConvolution omitted -- eval-mode identity.
    pre_p = jnp.dot(protos, W, preferred_element_type=jnp.float32)  # (m, D)
    pre_m = jnp.dot(meta, W, preferred_element_type=jnp.float32)    # (n, D)

    rowsum_top = (jnp.sum(proto_graph, axis=1, keepdims=True)
                  + jnp.sum(cross, axis=1, keepdims=True) + 1.0)    # (m, 1)
    # columns of a dim-0 softmax sum to exactly 1 -> colsum(cross) == 1
    rowsum_bot = jnp.sum(meta_graph, axis=1, keepdims=True) + 2.0   # (n, 1)

    out_top = (jnp.dot(proto_graph, pre_p, preferred_element_type=jnp.float32)
               + jnp.dot(cross, pre_m, preferred_element_type=jnp.float32)
               + pre_p) * pl.reciprocal(rowsum_top, approx=True)
    out_bot = (lax.dot_general(cross, pre_p, (((0,), (0,)), ((), ())),
                               preferred_element_type=jnp.float32)  # cross^T @ pre_p
               + jnp.dot(meta_graph, pre_m, preferred_element_type=jnp.float32)
               + pre_m) * pl.reciprocal(rowsum_bot, approx=True)

    rep_p = jnp.tanh(out_top + gcn_b)                               # (m, D)
    rep_m = jnp.tanh(out_bot + gcn_b)                               # (n, D)
    rep_ref[...] = rep_p

    # --- correlations on the representation (reuse xx / yy) ------------------
    ct = _mean_cosine(jnp.sum(rep_m * meta, axis=1, keepdims=True),
                      jnp.sum(rep_m * rep_m, axis=1, keepdims=True),
                      yy, 1.0 / n)
    cp = _mean_cosine(jnp.sum(rep_p * protos, axis=1, keepdims=True),
                      jnp.sum(rep_p * rep_p, axis=1, keepdims=True),
                      xx, 1.0 / m)

    # pack the three scalars into one lane-dense row -> a single output DMA
    col = lax.broadcasted_iota(jnp.int32, (1, 128), 1)
    corr_ref[...] = (cm * (col == 0).astype(jnp.float32)
                     + ct * (col == 1).astype(jnp.float32)
                     + cp * (col == 2).astype(jnp.float32))


# ---------------------------------------------------------------------------
# Wrapper
# ---------------------------------------------------------------------------
def metagraph_fd_forward(inputs, params, sigma=2.0):
    m, D = inputs.shape
    # sigma enters only as -1/(2*sigma); pass it via SMEM so it is a runtime
    # value (no recompile per sigma).
    scale = jnp.full((1, 1), -1.0 / (2.0 * float(sigma)), jnp.float32)
    vmem = pl.BlockSpec(memory_space=pltpu.MemorySpace.VMEM)
    smem = pl.BlockSpec(memory_space=pltpu.MemorySpace.SMEM)
    rep, corr = pl.pallas_call(
        _metagraph_kernel,
        out_shape=(
            jax.ShapeDtypeStruct((m, D), jnp.float32),
            jax.ShapeDtypeStruct((1, 128), jnp.float32),
        ),
        in_specs=[smem] + [vmem] * 7,
        out_specs=(vmem, vmem),
    )(scale, inputs, params["meta_vertex"], params["meta_buffer"],
      params["adj_w"], params["adj_b"], params["W"], params["gcn_b"])
    # buffer-update side effect: new buffer is meta_graph_vertex (detached).
    new_buffer = params["meta_vertex"]
    return rep, (corr[0, 0], corr[0, 1], corr[0, 2]), new_buffer


# ---------------------------------------------------------------------------
# Pure-JAX reference (for sanity check)
# ---------------------------------------------------------------------------
def _reference(inputs, p, sigma):
    hi = jax.lax.Precision.HIGHEST
    protos, meta, buf = inputs, p["meta_vertex"], p["meta_buffer"]
    adj_w, adj_b = p["adj_w"][0], p["adj_b"][0, 0]
    W, gcn_b = p["W"], p["gcn_b"][0]

    def cos(A, B):
        num = jnp.sum(A * B, axis=1)
        den = jnp.maximum(jnp.linalg.norm(A, axis=1) * jnp.linalg.norm(B, axis=1), 1e-8)
        return jnp.mean(num / den)

    def graph(A, B):
        diff = A[:, None, :] - B[None, :, :]
        g = jax.nn.sigmoid(jnp.einsum("ijd,d->ij", diff, adj_w, precision=hi) + adj_b)
        I = jnp.eye(B.shape[0], dtype=g.dtype)
        return g * (1 - I) + I

    c_meta = cos(buf, meta)
    mg, pg = graph(meta, meta), graph(protos, protos)
    xx = jnp.sum(protos ** 2, 1, keepdims=True)
    yy = jnp.sum(meta ** 2, 1, keepdims=True)
    dist = jnp.maximum(xx + yy.T - 2.0 * jnp.matmul(protos, meta.T, precision=hi), 1e-6)
    crossg = jax.nn.softmax(-dist / (2.0 * sigma), axis=0)
    adj = jnp.block([[pg, crossg], [crossg.T, mg]])
    feat = jnp.concatenate([protos, meta], axis=0)
    adj = adj + jnp.eye(adj.shape[0], dtype=adj.dtype)
    adj = adj / jnp.sum(adj, axis=1, keepdims=True)
    rep = jnp.tanh(jnp.matmul(adj, jnp.matmul(feat, W, precision=hi), precision=hi) + gcn_b)
    mB = protos.shape[0]
    return rep[:mB], (c_meta, cos(rep[mB:], meta), cos(rep[:mB], protos))


# ---------------------------------------------------------------------------
# Deterministic parameter init (mirrors module __init__ shapes; synthetic values)
# ---------------------------------------------------------------------------
def init_params(key, D, n_meta):
    k = jax.random.split(key, 5)
    return {
        "meta_vertex": jax.random.uniform(k[0], (n_meta, D), jnp.float32),   # torch.rand
        "meta_buffer": jax.random.uniform(k[1], (n_meta, D), jnp.float32),   # buffer torch.rand
        "adj_w": jax.random.normal(k[2], (1, D), jnp.float32),               # Truncated_initializer
        "adj_b": jnp.full((1, 1), 0.1, jnp.float32),                         # constant 0.1
        "W": jax.random.normal(k[3], (D, D), jnp.float32),                   # GCN weight
        "gcn_b": jnp.zeros((1, D), jnp.float32),                             # GCN bias (zeros)
    }


if __name__ == "__main__":
    D = 32          # hidden_dim == input_dim (required by the module's own math)
    batch = 8       # protos = inputs, batch nodes
    n_meta = 16     # meta_graph_vertex_num (small test size)
    sigma = 2.0

    key = jax.random.PRNGKey(0)
    kp, kx = jax.random.split(key)
    params = init_params(kp, D, n_meta)
    inputs = jax.random.normal(kx, (batch, D), jnp.float32)

    rep, (c_meta, c_trans, c_proto), new_buf = metagraph_fd_forward(inputs, params, sigma)
    jax.block_until_ready((rep, c_meta, c_trans, c_proto, new_buf))

    rep_ref, (cm_ref, ct_ref, cp_ref) = _reference(inputs, params, sigma)
    np.testing.assert_allclose(np.asarray(rep), np.asarray(rep_ref), atol=5e-3, rtol=5e-3)
    np.testing.assert_allclose(float(c_meta), float(cm_ref), atol=5e-3)
    np.testing.assert_allclose(float(c_trans), float(ct_ref), atol=5e-3)
    np.testing.assert_allclose(float(c_proto), float(cp_ref), atol=5e-3)

    print("KERNEL_OK")
</pallas_src>

<mosaic_0001>
module attributes {stable_mosaic.version = 11 : i64} {
  func.func @_metagraph_kernel(%arg0: memref<1x1xf32, #tpu.memory_space<smem>>, %arg1: memref<8x32xf32, #tpu.memory_space<vmem>>, %arg2: memref<16x32xf32, #tpu.memory_space<vmem>>, %arg3: memref<16x32xf32, #tpu.memory_space<vmem>>, %arg4: memref<1x32xf32, #tpu.memory_space<vmem>>, %arg5: memref<1x1xf32, #tpu.memory_space<vmem>>, %arg6: memref<32x32xf32, #tpu.memory_space<vmem>>, %arg7: memref<1x32xf32, #tpu.memory_space<vmem>>, %arg8: memref<8x32xf32, #tpu.memory_space<vmem>>, %arg9: memref<1x128xf32, #tpu.memory_space<vmem>>) attributes {dimension_semantics = [], scalar_prefetch = 0 : i64, scratch_operands = 0 : i64, tpu.core_type = #tpu.core_type<tc>} {
    %c0 = arith.constant 0 : index
    %c0_0 = arith.constant 0 : index
    %0 = vector.load %arg1[%c0, %c0_0] : memref<8x32xf32, #tpu.memory_space<vmem>>, vector<8x32xf32>
    %c0_1 = arith.constant 0 : index
    %c0_2 = arith.constant 0 : index
    %1 = vector.load %arg2[%c0_1, %c0_2] : memref<16x32xf32, #tpu.memory_space<vmem>>, vector<16x32xf32>
    %c0_3 = arith.constant 0 : index
    %c0_4 = arith.constant 0 : index
    %2 = vector.load %arg3[%c0_3, %c0_4] : memref<16x32xf32, #tpu.memory_space<vmem>>, vector<16x32xf32>
    %c0_5 = arith.constant 0 : index
    %c0_6 = arith.constant 0 : index
    %3 = vector.load %arg4[%c0_5, %c0_6] : memref<1x32xf32, #tpu.memory_space<vmem>>, vector<1x32xf32>
    %c0_7 = arith.constant 0 : index
    %c0_8 = arith.constant 0 : index
    %4 = vector.load %arg5[%c0_7, %c0_8] : memref<1x1xf32, #tpu.memory_space<vmem>>, vector<1x1xf32>
    %c0_9 = arith.constant 0 : index
    %c0_10 = arith.constant 0 : index
    %5 = vector.load %arg6[%c0_9, %c0_10] : memref<32x32xf32, #tpu.memory_space<vmem>>, vector<32x32xf32>
    %c0_11 = arith.constant 0 : index
    %c0_12 = arith.constant 0 : index
    %6 = vector.load %arg7[%c0_11, %c0_12] : memref<1x32xf32, #tpu.memory_space<vmem>>, vector<1x32xf32>
    %c0_13 = arith.constant 0 : index
    %c0_14 = arith.constant 0 : index
    %7 = memref.load %arg0[%c0_13, %c0_14] : memref<1x1xf32, #tpu.memory_space<smem>>
    %8 = arith.mulf %0, %0 : vector<8x32xf32>
    %cst = arith.constant dense<0.000000e+00> : vector<8xf32>
    %9 = vector.multi_reduction <add>, %8, %cst [1] : vector<8x32xf32> to vector<8xf32>
    %10 = vector.shape_cast %9 : vector<8xf32> to vector<8x1xf32>
    %11 = arith.mulf %1, %1 : vector<16x32xf32>
    %cst_15 = arith.constant dense<0.000000e+00> : vector<16xf32>
    %12 = vector.multi_reduction <add>, %11, %cst_15 [1] : vector<16x32xf32> to vector<16xf32>
    %13 = vector.shape_cast %12 : vector<16xf32> to vector<16x1xf32>
    %14 = arith.mulf %2, %1 : vector<16x32xf32>
    %cst_16 = arith.constant dense<0.000000e+00> : vector<16xf32>
    %15 = vector.multi_reduction <add>, %14, %cst_16 [1] : vector<16x32xf32> to vector<16xf32>
    %16 = vector.shape_cast %15 : vector<16xf32> to vector<16x1xf32>
    %17 = arith.mulf %2, %2 : vector<16x32xf32>
    %cst_17 = arith.constant dense<0.000000e+00> : vector<16xf32>
    %18 = vector.multi_reduction <add>, %17, %cst_17 [1] : vector<16x32xf32> to vector<16xf32>
    %19 = vector.shape_cast %18 : vector<16xf32> to vector<16x1xf32>
    %20 = arith.mulf %19, %13 : vector<16x1xf32>
    %21 = math.sqrt %20 : vector<16x1xf32>
    %cst_18 = arith.constant 9.99999993E-9 : f32
    %22 = vector.broadcast %cst_18 : f32 to vector<16x1xf32>
    %23 = arith.maximumf %21, %22 : vector<16x1xf32>
    %24 = tpu.reciprocal %23 {approx = true} : vector<16x1xf32> -> vector<16x1xf32>
    %25 = arith.mulf %16, %24 : vector<16x1xf32>
    %cst_19 = arith.constant dense<0.000000e+00> : vector<1xf32>
    %26 = vector.multi_reduction <add>, %25, %cst_19 [0] : vector<16x1xf32> to vector<1xf32>
    %27 = vector.shape_cast %26 : vector<1xf32> to vector<1x1xf32>
    %cst_20 = arith.constant 6.250000e-02 : f32
    %28 = vector.broadcast %cst_20 : f32 to vector<1x1xf32>
    %29 = arith.mulf %27, %28 : vector<1x1xf32>
    %30 = vector.broadcast %3 : vector<1x32xf32> to vector<16x32xf32>
    %31 = arith.mulf %1, %30 : vector<16x32xf32>
    %cst_21 = arith.constant dense<0.000000e+00> : vector<16xf32>
    %32 = vector.multi_reduction <add>, %31, %cst_21 [1] : vector<16x32xf32> to vector<16xf32>
    %33 = vector.shape_cast %32 : vector<16xf32> to vector<16x1xf32>
    %34 = vector.broadcast %3 : vector<1x32xf32> to vector<8x32xf32>
    %35 = arith.mulf %0, %34 : vector<8x32xf32>
    %cst_22 = arith.constant dense<0.000000e+00> : vector<8xf32>
    %36 = vector.multi_reduction <add>, %35, %cst_22 [1] : vector<8x32xf32> to vector<8xf32>
    %37 = vector.shape_cast %36 : vector<8xf32> to vector<8x1xf32>
    %38 = vector.broadcast %4 : vector<1x1xf32> to vector<16x1xf32>
    %39 = arith.addf %33, %38 : vector<16x1xf32>
    %40 = tpu.transpose %33, [1, 0] : vector<16x1xf32> -> vector<1x16xf32>
    %41 = vector.broadcast %39 : vector<16x1xf32> to vector<16x16xf32>
    %42 = vector.broadcast %40 : vector<1x16xf32> to vector<16x16xf32>
    %43 = arith.subf %41, %42 : vector<16x16xf32>
    %44 = arith.negf %43 : vector<16x16xf32>
    %45 = math.exp %44 : vector<16x16xf32>
    %cst_23 = arith.constant 1.000000e+00 : f32
    %46 = vector.broadcast %cst_23 : f32 to vector<16x16xf32>
    %47 = arith.addf %46, %45 : vector<16x16xf32>
    %48 = arith.divf %46, %47 : vector<16x16xf32>
    %49 = tpu.iota {dimensions = array<i32: 0>} : vector<16x16xi32>
    %50 = tpu.iota {dimensions = array<i32: 1>} : vector<16x16xi32>
    %51 = arith.cmpi eq, %49, %50 : vector<16x16xi32>
    %52 = arith.extui %51 : vector<16x16xi1> to vector<16x16xi32>
    %53 = arith.sitofp %52 : vector<16x16xi32> to vector<16x16xf32>
    %cst_24 = arith.constant 1.000000e+00 : f32
    %54 = vector.broadcast %cst_24 : f32 to vector<16x16xf32>
    %55 = arith.subf %54, %53 : vector<16x16xf32>
    %56 = arith.mulf %48, %55 : vector<16x16xf32>
    %57 = arith.addf %56, %53 : vector<16x16xf32>
    %58 = vector.broadcast %4 : vector<1x1xf32> to vector<8x1xf32>
    %59 = arith.addf %37, %58 : vector<8x1xf32>
    %60 = tpu.transpose %37, [1, 0] : vector<8x1xf32> -> vector<1x8xf32>
    %61 = vector.broadcast %59 : vector<8x1xf32> to vector<8x8xf32>
    %62 = vector.broadcast %60 : vector<1x8xf32> to vector<8x8xf32>
    %63 = arith.subf %61, %62 : vector<8x8xf32>
    %64 = arith.negf %63 : vector<8x8xf32>
    %65 = math.exp %64 : vector<8x8xf32>
    %cst_25 = arith.constant 1.000000e+00 : f32
    %66 = vector.broadcast %cst_25 : f32 to vector<8x8xf32>
    %67 = arith.addf %66, %65 : vector<8x8xf32>
    %68 = arith.divf %66, %67 : vector<8x8xf32>
    %69 = tpu.iota {dimensions = array<i32: 0>} : vector<8x8xi32>
    %70 = tpu.iota {dimensions = array<i32: 1>} : vector<8x8xi32>
    %71 = arith.cmpi eq, %69, %70 : vector<8x8xi32>
    %72 = arith.extui %71 : vector<8x8xi1> to vector<8x8xi32>
    %73 = arith.sitofp %72 : vector<8x8xi32> to vector<8x8xf32>
    %cst_26 = arith.constant 1.000000e+00 : f32
    %74 = vector.broadcast %cst_26 : f32 to vector<8x8xf32>
    %75 = arith.subf %74, %73 : vector<8x8xf32>
    %76 = arith.mulf %68, %75 : vector<8x8xf32>
    %77 = arith.addf %76, %73 : vector<8x8xf32>
    %cst_27 = arith.constant dense<0.000000e+00> : vector<8x16xf32>
    %78 = tpu.matmul %0, %1, %cst_27 {dimension_numbers = #tpu.dot_dimension_numbers<[1], [1], [0], [0], [0, 0, 1, 0], [], []>} : vector<8x32xf32>, vector<16x32xf32>, vector<8x16xf32> -> vector<8x16xf32>
    %79 = tpu.transpose %13, [1, 0] : vector<16x1xf32> -> vector<1x16xf32>
    %80 = vector.broadcast %10 : vector<8x1xf32> to vector<8x16xf32>
    %81 = vector.broadcast %79 : vector<1x16xf32> to vector<8x16xf32>
    %82 = arith.addf %80, %81 : vector<8x16xf32>
    %cst_28 = arith.constant 2.000000e+00 : f32
    %83 = vector.broadcast %cst_28 : f32 to vector<8x16xf32>
    %84 = arith.mulf %83, %78 : vector<8x16xf32>
    %85 = arith.subf %82, %84 : vector<8x16xf32>
    %cst_29 = arith.constant 9.99999997E-7 : f32
    %86 = vector.broadcast %cst_29 : f32 to vector<8x16xf32>
    %87 = arith.maximumf %85, %86 : vector<8x16xf32>
    %88 = vector.broadcast %7 : f32 to vector<8x16xf32>
    %89 = arith.mulf %87, %88 : vector<8x16xf32>
    %cst_30 = arith.constant dense<0xFF800000> : vector<16xf32>
    %90 = vector.multi_reduction <maximumf>, %89, %cst_30 [0] : vector<8x16xf32> to vector<16xf32>
    %91 = vector.shape_cast %90 : vector<16xf32> to vector<1x16xf32>
    %92 = vector.broadcast %91 : vector<1x16xf32> to vector<8x16xf32>
    %93 = arith.subf %89, %92 : vector<8x16xf32>
    %94 = math.exp %93 : vector<8x16xf32>
    %cst_31 = arith.constant dense<0.000000e+00> : vector<16xf32>
    %95 = vector.multi_reduction <add>, %94, %cst_31 [0] : vector<8x16xf32> to vector<16xf32>
    %96 = vector.shape_cast %95 : vector<16xf32> to vector<1x16xf32>
    %97 = tpu.reciprocal %96 {approx = true} : vector<1x16xf32> -> vector<1x16xf32>
    %98 = vector.broadcast %97 : vector<1x16xf32> to vector<8x16xf32>
    %99 = arith.mulf %94, %98 : vector<8x16xf32>
    %cst_32 = arith.constant dense<0.000000e+00> : vector<8x32xf32>
    %100 = tpu.matmul %0, %5, %cst_32 {dimension_numbers = #tpu.dot_dimension_numbers<[1], [0], [0], [1], [0, 0, 1, 1], [], []>} : vector<8x32xf32>, vector<32x32xf32>, vector<8x32xf32> -> vector<8x32xf32>
    %cst_33 = arith.constant dense<0.000000e+00> : vector<16x32xf32>
    %101 = tpu.matmul %1, %5, %cst_33 {dimension_numbers = #tpu.dot_dimension_numbers<[1], [0], [0], [1], [0, 0, 1, 1], [], []>} : vector<16x32xf32>, vector<32x32xf32>, vector<16x32xf32> -> vector<16x32xf32>
    %cst_34 = arith.constant dense<0.000000e+00> : vector<8xf32>
    %102 = vector.multi_reduction <add>, %77, %cst_34 [1] : vector<8x8xf32> to vector<8xf32>
    %103 = vector.shape_cast %102 : vector<8xf32> to vector<8x1xf32>
    %cst_35 = arith.constant dense<0.000000e+00> : vector<8xf32>
    %104 = vector.multi_reduction <add>, %99, %cst_35 [1] : vector<8x16xf32> to vector<8xf32>
    %105 = vector.shape_cast %104 : vector<8xf32> to vector<8x1xf32>
    %106 = arith.addf %103, %105 : vector<8x1xf32>
    %cst_36 = arith.constant 1.000000e+00 : f32
    %107 = vector.broadcast %cst_36 : f32 to vector<8x1xf32>
    %108 = arith.addf %106, %107 : vector<8x1xf32>
    %cst_37 = arith.constant dense<0.000000e+00> : vector<16xf32>
    %109 = vector.multi_reduction <add>, %57, %cst_37 [1] : vector<16x16xf32> to vector<16xf32>
    %110 = vector.shape_cast %109 : vector<16xf32> to vector<16x1xf32>
    %cst_38 = arith.constant 2.000000e+00 : f32
    %111 = vector.broadcast %cst_38 : f32 to vector<16x1xf32>
    %112 = arith.addf %110, %111 : vector<16x1xf32>
    %cst_39 = arith.constant dense<0.000000e+00> : vector<8x32xf32>
    %113 = tpu.matmul %77, %100, %cst_39 {dimension_numbers = #tpu.dot_dimension_numbers<[1], [0], [0], [1], [0, 0, 1, 1], [], []>} : vector<8x8xf32>, vector<8x32xf32>, vector<8x32xf32> -> vector<8x32xf32>
    %cst_40 = arith.constant dense<0.000000e+00> : vector<8x32xf32>
    %114 = tpu.matmul %99, %101, %cst_40 {dimension_numbers = #tpu.dot_dimension_numbers<[1], [0], [0], [1], [0, 0, 1, 1], [], []>} : vector<8x16xf32>, vector<16x32xf32>, vector<8x32xf32> -> vector<8x32xf32>
    %115 = arith.addf %113, %114 : vector<8x32xf32>
    %116 = arith.addf %115, %100 : vector<8x32xf32>
    %117 = tpu.reciprocal %108 {approx = true} : vector<8x1xf32> -> vector<8x1xf32>
    %118 = vector.broadcast %117 : vector<8x1xf32> to vector<8x32xf32>
    %119 = arith.mulf %116, %118 : vector<8x32xf32>
    %cst_41 = arith.constant dense<0.000000e+00> : vector<16x32xf32>
    %120 = tpu.matmul %99, %100, %cst_41 {dimension_numbers = #tpu.dot_dimension_numbers<[0], [0], [1], [1], [0, 1, 1, 1], [], []>} : vector<8x16xf32>, vector<8x32xf32>, vector<16x32xf32> -> vector<16x32xf32>
    %cst_42 = arith.constant dense<0.000000e+00> : vector<16x32xf32>
    %121 = tpu.matmul %57, %101, %cst_42 {dimension_numbers = #tpu.dot_dimension_numbers<[1], [0], [0], [1], [0, 0, 1, 1], [], []>} : vector<16x16xf32>, vector<16x32xf32>, vector<16x32xf32> -> vector<16x32xf32>
    %122 = arith.addf %120, %121 : vector<16x32xf32>
    %123 = arith.addf %122, %101 : vector<16x32xf32>
    %124 = tpu.reciprocal %112 {approx = true} : vector<16x1xf32> -> vector<16x1xf32>
    %125 = vector.broadcast %124 : vector<16x1xf32> to vector<16x32xf32>
    %126 = arith.mulf %123, %125 : vector<16x32xf32>
    %127 = vector.broadcast %6 : vector<1x32xf32> to vector<8x32xf32>
    %128 = arith.addf %119, %127 : vector<8x32xf32>
    %129 = math.tanh %128 : vector<8x32xf32>
    %130 = vector.broadcast %6 : vector<1x32xf32> to vector<16x32xf32>
    %131 = arith.addf %126, %130 : vector<16x32xf32>
    %132 = math.tanh %131 : vector<16x32xf32>
    %c0_43 = arith.constant 0 : index
    %c0_44 = arith.constant 0 : index
    %133 = vector.load %arg8[%c0_43, %c0_44] : memref<8x32xf32, #tpu.memory_space<vmem>>, vector<8x32xf32>
    tpu.vector_store %arg8[%c0_43, %c0_44], %129 {strides = array<i32>} : memref<8x32xf32, #tpu.memory_space<vmem>>, vector<8x32xf32>,
    %134 = arith.mulf %132, %1 : vector<16x32xf32>
    %cst_45 = arith.constant dense<0.000000e+00> : vector<16xf32>
    %135 = vector.multi_reduction <add>, %134, %cst_45 [1] : vector<16x32xf32> to vector<16xf32>
    %136 = vector.shape_cast %135 : vector<16xf32> to vector<16x1xf32>
    %137 = arith.mulf %132, %132 : vector<16x32xf32>
    %cst_46 = arith.constant dense<0.000000e+00> : vector<16xf32>
    %138 = vector.multi_reduction <add>, %137, %cst_46 [1] : vector<16x32xf32> to vector<16xf32>
    %139 = vector.shape_cast %138 : vector<16xf32> to vector<16x1xf32>
    %140 = arith.mulf %139, %13 : vector<16x1xf32>
    %141 = math.sqrt %140 : vector<16x1xf32>
    %cst_47 = arith.constant 9.99999993E-9 : f32
    %142 = vector.broadcast %cst_47 : f32 to vector<16x1xf32>
    %143 = arith.maximumf %141, %142 : vector<16x1xf32>
    %144 = tpu.reciprocal %143 {approx = true} : vector<16x1xf32> -> vector<16x1xf32>
    %145 = arith.mulf %136, %144 : vector<16x1xf32>
    %cst_48 = arith.constant dense<0.000000e+00> : vector<1xf32>
    %146 = vector.multi_reduction <add>, %145, %cst_48 [0] : vector<16x1xf32> to vector<1xf32>
    %147 = vector.shape_cast %146 : vector<1xf32> to vector<1x1xf32>
    %cst_49 = arith.constant 6.250000e-02 : f32
    %148 = vector.broadcast %cst_49 : f32 to vector<1x1xf32>
    %149 = arith.mulf %147, %148 : vector<1x1xf32>
    %150 = arith.mulf %129, %0 : vector<8x32xf32>
    %cst_50 = arith.constant dense<0.000000e+00> : vector<8xf32>
    %151 = vector.multi_reduction <add>, %150, %cst_50 [1] : vector<8x32xf32> to vector<8xf32>
    %152 = vector.shape_cast %151 : vector<8xf32> to vector<8x1xf32>
    %153 = arith.mulf %129, %129 : vector<8x32xf32>
    %cst_51 = arith.constant dense<0.000000e+00> : vector<8xf32>
    %154 = vector.multi_reduction <add>, %153, %cst_51 [1] : vector<8x32xf32> to vector<8xf32>
    %155 = vector.shape_cast %154 : vector<8xf32> to vector<8x1xf32>
    %156 = arith.mulf %155, %10 : vector<8x1xf32>
    %157 = math.sqrt %156 : vector<8x1xf32>
    %cst_52 = arith.constant 9.99999993E-9 : f32
    %158 = vector.broadcast %cst_52 : f32 to vector<8x1xf32>
    %159 = arith.maximumf %157, %158 : vector<8x1xf32>
    %160 = tpu.reciprocal %159 {approx = true} : vector<8x1xf32> -> vector<8x1xf32>
    %161 = arith.mulf %152, %160 : vector<8x1xf32>
    %cst_53 = arith.constant dense<0.000000e+00> : vector<1xf32>
    %162 = vector.multi_reduction <add>, %161, %cst_53 [0] : vector<8x1xf32> to vector<1xf32>
    %163 = vector.shape_cast %162 : vector<1xf32> to vector<1x1xf32>
    %cst_54 = arith.constant 1.250000e-01 : f32
    %164 = vector.broadcast %cst_54 : f32 to vector<1x1xf32>
    %165 = arith.mulf %163, %164 : vector<1x1xf32>
    %166 = tpu.iota {dimensions = array<i32: 1>} : vector<1x128xi32>
    %c0_i32 = arith.constant 0 : i32
    %167 = vector.broadcast %c0_i32 : i32 to vector<1x128xi32>
    %168 = arith.cmpi eq, %166, %167 : vector<1x128xi32>
    %169 = arith.extui %168 : vector<1x128xi1> to vector<1x128xi32>
    %170 = arith.sitofp %169 : vector<1x128xi32> to vector<1x128xf32>
    %171 = vector.broadcast %29 : vector<1x1xf32> to vector<1x128xf32>
    %172 = arith.mulf %171, %170 : vector<1x128xf32>
    %c1_i32 = arith.constant 1 : i32
    %173 = vector.broadcast %c1_i32 : i32 to vector<1x128xi32>
    %174 = arith.cmpi eq, %166, %173 : vector<1x128xi32>
    %175 = arith.extui %174 : vector<1x128xi1> to vector<1x128xi32>
    %176 = arith.sitofp %175 : vector<1x128xi32> to vector<1x128xf32>
    %177 = vector.broadcast %149 : vector<1x1xf32> to vector<1x128xf32>
    %178 = arith.mulf %177, %176 : vector<1x128xf32>
    %179 = arith.addf %172, %178 : vector<1x128xf32>
    %c2_i32 = arith.constant 2 : i32
    %180 = vector.broadcast %c2_i32 : i32 to vector<1x128xi32>
    %181 = arith.cmpi eq, %166, %180 : vector<1x128xi32>
    %182 = arith.extui %181 : vector<1x128xi1> to vector<1x128xi32>
    %183 = arith.sitofp %182 : vector<1x128xi32> to vector<1x128xf32>
    %184 = vector.broadcast %165 : vector<1x1xf32> to vector<1x128xf32>
    %185 = arith.mulf %184, %183 : vector<1x128xf32>
    %186 = arith.addf %179, %185 : vector<1x128xf32>
    %c0_55 = arith.constant 0 : index
    %c0_56 = arith.constant 0 : index
    %187 = vector.load %arg9[%c0_55, %c0_56] : memref<1x128xf32, #tpu.memory_space<vmem>>, vector<1x128xf32>
    tpu.vector_store %arg9[%c0_55, %c0_56], %186 {strides = array<i32>} : memref<1x128xf32, #tpu.memory_space<vmem>>, vector<1x128xf32>,
    return
  }
}

</mosaic_0001>

<bundles_post_ra>
// kernel: tpu_custom_call.1
= control target key start
LH: loop header
LB: loop body
LE: loop exit
PB: predicated region body
PF: predicated region fallthrough
CT: control target
= control target key end

     0   :  { %s1625_s0 = inlined_call_operand.<no memory space> [shape: f32[1,1], index: 0, kind: input, shape index: {}]   ;;  %s1626_s1 = inlined_call_operand.hbm [shape: f32[8,32], index: 1, kind: input, shape index: {}]   ;;  %s1627_s2 = inlined_call_operand.hbm [shape: f32[16,32], index: 2, kind: input, shape index: {}]   ;;  %s1628_s3 = inlined_call_operand.hbm [shape: f32[16,32], index: 3, kind: input, shape index: {}]   ;;  %s1629_s4 = inlined_call_operand.vmem [shape: f32[1,32], index: 4, kind: input, shape index: {}]   ;;  %s1630_s5 = inlined_call_operand.<no memory space> [shape: f32[1,1], index: 5, kind: input, shape index: {}]   ;;  %s1631_s6 = inlined_call_operand.hbm [shape: f32[32,32], index: 6, kind: input, shape index: {}]   ;;  %s1632_s7 = inlined_call_operand.vmem [shape: f32[1,32], index: 7, kind: input, shape index: {}]   ;;  %s1633_s8 = inlined_call_operand.hbm [shape: f32[8,32], index: 8, kind: output, shape index: {0}]   ;;  %s1634_s9 = inlined_call_operand.hbm [shape: f32[1,128], index: 9, kind: output, shape index: {1}]  }
   0x1   :  { %v16_v0 = vstv %s1630_s5 }
   0x2   :  { %17 = vst [vmem:[#allocation3] sm:$0x1] %v16_v0 }
   0x3   :  { %18 = vsyncpa [#allocation5], 0 }
   0x4   :  { %19 = vsyncpa [#allocation8], 0 }
   0x5   :  { %20 = vsyncpa [#allocation11], 0 }
   0x6   :  { %21 = vsyncpa [#allocation6], 0 }
   0x7   :  { %22 = vsyncpa [#allocation14], 0  ;;  %s1391_s11 = smov [#allocation7]  }
   0x8   :  { %s40_s12 = sshll.u32 %s1391_s11, 4  ;;  %s41_s12 = int_to_ptr.vmem [resolvable:$true] %s40_s12 }
   0x9   :  { %s1269_s13 = scalar_lea.vmem %s41_s12, 256  ;;  %p1274_p1 = scmp.lt.s32.totalorder %s41_s12, %s41_s12 }
   0xa   :  { %p1270_p0 = scmp.ne.s32.totalorder %s41_s12, %s1269_s13  ;;  %p1275_p2 = scmp.lt.s32.totalorder %s1269_s13, %s1269_s13 }
   0xc   :  { %p1276_p3 = por %p1275_p2, %p1274_p1 }
   0xe   :  { %p1277_p4 = pnand %p1276_p3, %p1270_p0 }
  0x10   :  { %1280 = shalt.err (!%p1277_p4)
}
  0x11   :  { %s1392_s14 = smov 128   ;;  %s1393_s15 = smov 8  }
  0x12   :  { %46 = dma.hbm_to_vmem [thread:$0]  %s1627_s2, 256, %s41_s12, [#allocation8], %s1392_s14, %s1392_s14, %s1393_s15  }
  0x13   :  { %s1394_s17 = smov [#allocation4]   ;;  %s1395_s19 = smov [#allocation9]  }
  0x14   :  { %s31_s18 = sshll.u32 %s1394_s17, 4  ;;  %s52_s20 = sshll.u32 %s1395_s19, 4  ;;  %s32_s18 = int_to_ptr.vmem [resolvable:$true] %s31_s18  ;;  %s53_s20 = int_to_ptr.vmem [resolvable:$true] %s52_s20 }
  0x15   :  { %s1289_s21 = scalar_lea.vmem %s32_s18, 128  ;;  %p1294_p6 = scmp.lt.s32.totalorder %s32_s18, %s32_s18 }
  0x16   :  { %p1290_p5 = scmp.ne.s32.totalorder %s32_s18, %s1289_s21  ;;  %p1295_p7 = scmp.lt.s32.totalorder %s1289_s21, %s1289_s21 }
  0x18   :  { %p1296_p8 = por %p1295_p7, %p1294_p6 }
  0x1a   :  { %p1297_p9 = pnand %p1296_p8, %p1290_p5 }
  0x1c   :  { %1300 = shalt.err (!%p1297_p9)
}
  0x1d   :  { %34 = dma.hbm_to_vmem [thread:$0]  %s1626_s1, 128, %s32_s18, [#allocation5]  }
  0x1e   :  { %s1309_s24 = scalar_lea.vmem %s53_s20, 256  ;;  %p1314_p11 = scmp.lt.s32.totalorder %s53_s20, %s53_s20 }
  0x1f   :  { %p1310_p10 = scmp.ne.s32.totalorder %s53_s20, %s1309_s24  ;;  %p1315_p12 = scmp.lt.s32.totalorder %s1309_s24, %s1309_s24 }
  0x21   :  { %p1316_p13 = por %p1315_p12, %p1314_p11 }
  0x23   :  { %p1317_p0 = pnand %p1316_p13, %p1310_p10 }
  0x25   :  { %1320 = shalt.err (!%p1317_p0)
}
  0x26   :  { %58 = dma.hbm_to_vmem [thread:$0]  %s1628_s3, 256, %s53_s20, [#allocation8], %s1392_s14, %s1392_s14, %s1393_s15  }
  0x27   :  { %s1396_s26 = smov [#allocation10]  }
  0x28   :  { %s68_s27 = sshll.u32 %s1396_s26, 4  ;;  %s69_s27 = int_to_ptr.vmem [resolvable:$true] %s68_s27 }
  0x29   :  { %s1329_s28 = scalar_lea.vmem %s69_s27, 512  ;;  %p1334_p2 = scmp.lt.s32.totalorder %s69_s27, %s69_s27 }
  0x2a   :  { %p1330_p1 = scmp.ne.s32.totalorder %s69_s27, %s1329_s28  ;;  %p1335_p3 = scmp.lt.s32.totalorder %s1329_s28, %s1329_s28 }
  0x2c   :  { %p1336_p4 = por %p1335_p3, %p1334_p2 }
  0x2e   :  { %p1337_p5 = pnand %p1336_p4, %p1330_p1 }
  0x30   :  { %1340 = shalt.err (!%p1337_p5)
}
  0x31   :  { %74 = dma.hbm_to_vmem [thread:$0]  %s1631_s6, 512, %s69_s27, [#allocation11], %s1392_s14, %s1392_s14, %s1393_s15  }
  0x32   :  { %1381 = dma.done.wait [#allocation5], 128  }
  0x33   :  { %1382 = vsyncadd [#allocation5], 4294967168 }
  0x34   :  { %1383 = dma.done.wait [#allocation8], 512  }
  0x35   :  { %1384 = vsyncadd [#allocation8], 4294966784 }
  0x36   :  { %1385 = dma.done.wait [#allocation11], 512  }
  0x37   :  { %1386 = vsyncadd [#allocation11], 4294966784  ;;  %v1397_v1 = vmov 0.0   ;;  %vm1398_vm0 = vmmov 0   ;;  %v1482_v2 = vld [vmem:[#allocation7] sm:$0xff]  ;;  %vm103_vm1 = vcmask 261120   ;;  %v229_v38 = vlaneseq }
  0x38   :  { %1147 = vmatprep.subr.mxu0 %v1397_v1  ;;  %1151 = vmatprep.mubr.msk.f32.mxu0 %vm1398_vm0, %v1397_v1  ;;  %v1484_v3 = vld [vmem:[#allocation4] sm:$0xff]  ;;  %v1098_v4 = vld [vmem:[%s1629_s4] ss:$0 sm:$0xff]  ;;  %v107_v5 = vmul.f32 %v1482_v2, %v1482_v2  ;;  %v1492_v7 = vld [vmem:[#allocation7 + $0x8] sm:$0xff]  ;;  %v1399_v22 = vmov 0   ;;  %v434_v49 = vstv %s1625_s0  ;;  %vm436_vm2 = vcmask 130048  }
  0x39   :  { %1154 = vmatprep.subr.mxu1 %v1397_v1  ;;  %1162 = vmatprep.mubr.msk.f32.mxu1 %vm1398_vm0, %v1397_v1  ;;  %v175_v6 = vmul.f32 %v1098_v4, %v1484_v3  ;;  %v167_v8 = vmul.f32 %v1098_v4, %v1482_v2  ;;  %v99_v9 = vld [vmem:[#allocation10 + $0x18] sm:$0xff]  ;;  %v108_v10 = vmul.f32 %v1492_v7, %v1492_v7  ;;  %v98_v13 = vld [vmem:[#allocation10 + $0x10] sm:$0xff]  ;;  %v97_v18 = vld [vmem:[#allocation10 + $0x8] sm:$0xff]  ;;  %v230_v39 = vshrl.u32 %v229_v38, 7 }
  0x3a   :  { %1148 = vmatpush3.xpose.msk.msra.mxu0 %vm103_vm1, %v1492_v7  ;;  %1155 = vmatpush3.msra.mxu1 %v99_v9  ;;  %v109_v11 = vsel %vm103_vm1, %v107_v5, 0.0  ;;  %v168_v16 = vmul.f32 %v1098_v4, %v1492_v7  ;;  %v102_v17 = vmul.f32 %v1484_v3, %v1484_v3  ;;  %v96_v21 = vld [vmem:[#allocation10] sm:$0xff]  ;;  %v1099_v23 = vld [vmem:[#allocation3] ss:$0 sm:$0xff]  ;;  %vm601_vm5 = vcmask 64512  }
  0x3b   :  { %v176_v12 = vsel %vm103_vm1, %v175_v6, 0.0  ;;  %1149 = vmatprep.subr.mxu0 %v1397_v1  ;;  %1156 = vmatprep.subr.mxu1 %v1397_v1  ;;  %v112_v14 = vsel %vm103_vm1, %v108_v10, 0.0  ;;  %v169_v15 = vsel %vm103_vm1, %v167_v8, 0.0  ;;  %v1548_v41 = vsub.s32 0, %v230_v39 }
  0x3c   :  { %110 = vadd.xlane.f32.xlu0 %v109_v11  ;;  %177 = vadd.xlane.f32.xlu1 %v176_v12  ;;  %v172_v19 = vsel %vm103_vm1, %v168_v16, 0.0  ;;  %v104_v20 = vsel %vm103_vm1, %v102_v17, 0.0  ;;  %v1557_v12 = vand.u32 127, %v229_v38 }
  0x3d   :  { %1157 = vmatpush3.msra.mxu1 %v98_v13  ;;  %1211 = vset.pattern.permute.xlu1 %v1399_v22 }
  0x3e   :  { %1150 = vmatpush3.xpose.msk.msra.mxu0 %vm103_vm1, %v1482_v2  ;;  %1158 = vmatprep.subr.mxu1 %v1397_v1  ;;  %vm252_vm4 = vcmp.eq.s32.totalorder %v230_v39, %v1557_v12 }
  0x3f   :  { %1165 = vmatprep.subr.mxu0 %v99_v9  ;;  %1159 = vmatpush3.msra.mxu1 %v97_v18 }
  0x40   :  { %113 = vadd.xlane.f32.xlu0 %v112_v14  ;;  %170 = vadd.xlane.f32.xlu1 %v169_v15  ;;  %v1102_v15 = vsel %vm252_vm4, 1.0, %v1397_v1 }
  0x41   :  { %1152 = vmatmul.mubr.msk.f32.vlgmr.msra.gmra.mxu0 %vm103_vm1, %v1484_v3  ;;  %1160 = vmatprep.subr.mxu1 %v1397_v1 }
  0x42   :  { %1166 = vmatpush3.msra.mxu0 %v99_v9  ;;  %1173 = vmatprep.mubr.msk.f32.mxu0 %vm103_vm1, %v1482_v2 }
  0x43   :  { %1167 = vmatprep.subr.mxu0 %v98_v13  ;;  %1161 = vmatpush3.msra.mxu1 %v96_v21 }
  0x44   :  { %173 = vadd.xlane.f32.xlu1 %v172_v19  ;;  %105 = vadd.xlane.f32.xlu0 %v104_v20  ;;  %v258_v20 = vsub.f32 1.0, %v1102_v15 }
  0x45   :  { %1168 = vmatpush3.msra.mxu0 %v98_v13  ;;  %1163 = vmatmul.mubr.msk.f32.vlgmr.msra.gmra.mxu1 %vm103_vm1, %v1484_v3  ;;  %v249_v13 = vadd.s32 8, %v230_v39 }
  0x46   :  { %1169 = vmatprep.subr.mxu0 %v97_v18  ;;  %1176 = vmatprep.subr.mxu1 %v1397_v1 }
  0x47   :  { %1170 = vmatpush3.msra.mxu0 %v97_v18  ;;  %1180 = vmatprep.mubr.msk.f32.mxu1 %vm1398_vm0, %v1397_v1  ;;  %vm253_vm3 = vcmp.eq.s32.totalorder %v249_v13, %v1557_v12 }
  0x48   :  { %1171 = vmatprep.subr.mxu0 %v96_v21  ;;  %v1103_v14 = vsel %vm253_vm3, 1.0, %v1397_v1 }
  0x49   :  { %1172 = vmatpush3.msra.mxu0 %v96_v21  ;;  %v259_v18 = vsub.f32 1.0, %v1103_v14 }
  0x4a   :  { %1174 = vmatmul.mubr.msk.f32.vlgmr.msra.gmra.mxu0 %vm103_vm1, %v1492_v7 }
  0xc5   :  { %v1526_v24 = vpop.xlane.xlu0 %110  ;;  %v178_v25 = vpop.xlane.xlu1 %177 }
  0xc6   :  { %v264_v26 = vadd.f32 %v1099_v23, %v178_v25  ;;  %394 = vxpose.xlu0.b32.start [1/2] (short) (narrow) %v1526_v24, 8 }
  0xc8   :  { %299 = vperm.xlu1 %1211, %v264_v26  }
  0xc9   :  { %v1529_v27 = vpop.xlane.xlu0 %113  ;;  %v171_v28 = vpop.xlane.xlu1 %170 }
  0xca   :  { %v185_v29 = vadd.f32 %v1099_v23, %v171_v28  ;;  %395 = vxpose.xlu0.b32.end [2/2] (short) (narrow) %v1529_v27, 8 }
  0xcc   :  { %221 = vperm.xlu1 %1211, %v185_v29  }
  0xcd   :  { %v174_v30 = vpop.xlane.xlu1 %173  ;;  %v1546_v40 = vpop.xlane.xlu0 %105 }
  0xce   :  { %v186_v31 = vadd.f32 %v1099_v23, %v174_v30  ;;  %187 = vxpose.xlu0.b32.start [1/2] (short) (narrow) %v171_v28, 8 }
  0xd0   :  { %226 = vperm.xlu1 %1211, %v186_v31  }
  0xd2   :  { %188 = vxpose.xlu0.b32.end [2/2] (short) (narrow) %v174_v30, 8 }
  0xf9   :  { %265 = vxpose.xlu1.b32.start.end [1/1] (short) (narrow) %v178_v25, 8 }
 0x101   :  { %v390_v32 = vpop.f32.mrf.mxu0 }
 0x102   :  { %v431_v43 = vmul.f32 2.0, %v390_v32 }
 0x103   :  { %v1153_v33 = vpop.f32.mrf.mxu0 }
 0x105   :  { %v1539_v36 = vpop.f32.mrf.mxu1 }
 0x107   :  { %v1164_v37 = vpop.f32.mrf.mxu1 }
 0x10a   :  { %v1532_v34 = vpop.f32.mrf.mxu0 }
 0x10b   :  { %1177 = vmatpush3.msra.mxu1 %v1532_v34  ;;  %1188 = vmatprep.subr.mxu0 %v1532_v34 }
 0x10c   :  { %v1536_v35 = vpop.f32.mrf.mxu0  ;;  %1178 = vmatprep.subr.mxu1 %v1397_v1  ;;  %1189 = vmatpush3.msra.mxu0 %v1532_v34 }
 0x10d   :  { %1179 = vmatpush3.msra.mxu1 %v1536_v35  ;;  %1190 = vmatprep.subr.mxu0 %v1536_v35 }
 0x10e   :  { %1183 = vmatprep.subr.mxu1 %v1397_v1  ;;  %1191 = vmatpush3.msra.mxu0 %v1536_v35 }
 0x142   :  { %v410_v42 = vpop.trf.xlu0 }
 0x143   :  { %v429_v44 = vrot.slane %v410_v42, %v1548_v41  ;;  %v300_v45 = vpop.permute.xlu1 %299 }
 0x145   :  { %v430_v46 = vadd.f32 %v429_v44, %v1546_v40 }
 0x147   :  { %v432_v47 = vsub.f32 %v430_v46, %v431_v43  ;;  %v222_v48 = vpop.permute.xlu1 %221 }
 0x149   :  { %v433_v50 = vmax.f32 %v432_v47, 1e-06 }
 0x14a   :  { %v203_v51 = vpop.trf.xlu0 }
 0x14b   :  { %v435_v52 = vmul.f32 %v434_v49, %v433_v50  ;;  %v232_v53 = vrot.slane %v203_v51, %v1548_v41  ;;  %v227_v54 = vpop.permute.xlu1 %226 }
 0x14d   :  { %v437_v55 = vsel %vm436_vm2, %v435_v52, -inf  ;;  %v233_v56 = vsub.f32 %v222_v48, %v232_v53  ;;  %v234_v57 = vsub.f32 %v227_v54, %v232_v53  ;;  %v1575_v53 = vld [vmem:[#allocation9 + $0x8] sm:$0xff] }
 0x14e   :  { %v438_v58 = vrot.slane %v437_v55, 4 }
 0x14f   :  { %v1100_v59 = vmul.f32 -1.442695, %v233_v56  ;;  %v1101_v60 = vmul.f32 -1.442695, %v234_v57  ;;  %v92_v57 = vld [vmem:[#allocation9] sm:$0xff] }
 0x150   :  { %v439_v61 = vmax.f32 %v437_v55, %v438_v58  ;;  %v124_v55 = vmul.f32 %v1575_v53, %v1575_v53  ;;  %v123_v58 = vmul.f32 %v92_v57, %v92_v57 }
 0x151   :  { %1213 = vpow2.f32 %v1100_v59 }
 0x152   :  { %v440_v62 = vrot.slane %v439_v61, 2  ;;  %1215 = vpow2.f32 %v1101_v60  ;;  %v128_v56 = vsel %vm103_vm1, %v124_v55, 0.0  ;;  %v125_v59 = vsel %vm103_vm1, %v123_v58, 0.0 }
 0x154   :  { %v441_v63 = vmax.f32 %v439_v61, %v440_v62 }
 0x156   :  { %v442_v0 = vrot.slane %v441_v63, 1 }
 0x158   :  { %v443_v4 = vmax.f32 %v441_v63, %v442_v0 }
 0x15a   :  { %v444_v5 = vsub.f32 %v435_v52, %v443_v4 }
 0x15c   :  { %v445_v6 = vmul.f32 1.442695, %v444_v5 }
 0x15e   :  { %v1214_v8 = vpop.eup %1213  ;;  %1217 = vpow2.f32 %v445_v6 }
 0x15f   :  { %v1216_v9 = vpop.eup %1215  ;;  %v241_v10 = vadd.f32 1.0, %v1214_v8 }
 0x160   :  { %v242_v11 = vadd.f32 1.0, %v1216_v9 }
 0x161   :  { %1219 = vrcp.f32 %v241_v10 }
 0x162   :  { %1221 = vrcp.f32 %v242_v11 }
 0x16b   :  { %v1218_v16 = vpop.eup %1217 }
 0x16c   :  { %v447_v17 = vsel %vm436_vm2, %v1218_v16, 0.0 }
 0x16d   :  { %v448_v19 = vrot.slane %v447_v17, 4 }
 0x16e   :  { %v1220_v21 = vpop.eup %1219 }
 0x16f   :  { %v1222_v23 = vpop.eup %1221  ;;  %v449_v25 = vadd.f32 %v448_v19, %v447_v17  ;;  %v260_v26 = vmul.f32 %v1220_v21, %v258_v20 }
 0x170   :  { %v261_v28 = vmul.f32 %v1222_v23, %v259_v18 }
 0x171   :  { %v450_v29 = vrot.slane %v449_v25, 2  ;;  %v262_v30 = vadd.f32 %v1102_v15, %v260_v26 }
 0x172   :  { %v263_v31 = vadd.f32 %v1103_v14, %v261_v28  ;;  %v1117_v14 = vld [vmem:[%s1632_s7] ss:$0 sm:$0xff]  ;;  %s1400_s7 = smov [#allocation12]  }
 0x173   :  { %v451_v32 = vadd.f32 %v450_v29, %v449_v25  ;;  %v610_v33 = vsel %vm436_vm2, %v262_v30, 0.0  ;;  %1192 = vmatprep.mubr.msk.f32.mxu0 %vm436_vm2, %v262_v30  ;;  %s1073_s11 = sshll.u32 %s1400_s7, 4  ;;  %s1074_s11 = int_to_ptr.vmem [resolvable:$true] %s1073_s11 }
 0x174   :  { %v613_v37 = vsel %vm436_vm2, %v263_v31, 0.0  ;;  %1193 = vmatmul.mubr.msk.f32.vlgmr.msra.gmra.mxu0 %vm436_vm2, %v263_v31  ;;  %s1341_s12 = scalar_lea.vmem %s1074_s11, 128  ;;  %p1346_p7 = scmp.lt.s32.totalorder %s1074_s11, %s1074_s11 }
 0x175   :  { %v281_v38 = vpop.trf.xlu1  ;;  %v452_v39 = vrot.slane %v451_v32, 1  ;;  %614 = vadd.xlane.f32.xlu1 %v613_v37  ;;  %p1342_p6 = scmp.ne.s32.totalorder %s1074_s11, %s1341_s12  ;;  %p1347_p8 = scmp.lt.s32.totalorder %s1341_s12, %s1341_s12 }
 0x176   :  { %v305_v42 = vrot.slane %v281_v38, %v1548_v41 }
 0x177   :  { %v453_v43 = vadd.f32 %v452_v39, %v451_v32  ;;  %p1348_p9 = por %p1347_p8, %p1346_p7 }
 0x178   :  { %v306_v44 = vsub.f32 %v300_v45, %v305_v42 }
 0x179   :  { %1223 = vrcp.f32 %v453_v43  ;;  %p1349_p10 = pnand %p1348_p9, %p1342_p6 }
 0x17a   :  { %v1104_v46 = vmul.f32 -1.442695, %v306_v44  ;;  %v115_v44 = vmul.f32 %v92_v57, %v1482_v2 }
 0x17c   :  { %1225 = vpow2.f32 %v1104_v46 }
 0x186   :  { %v1224_v47 = vpop.eup %1223 }
 0x187   :  { %v455_v48 = vmul.f32 %v1224_v47, %v1218_v16 }
 0x189   :  { %v1226_v49 = vpop.eup %1225  ;;  %848 = vxpose.xlu0.b32.start.end [1/1] (short) (narrow) %v455_v48, 16  ;;  %1181 = vmatmul.mubr.msk.f32.vlgmr.msra.gmra.mxu1 %vm436_vm2, %v455_v48  ;;  %v605_v50 = vsel %vm436_vm2, %v455_v48, 0.0 }
 0x18a   :  { %v310_v51 = vadd.f32 1.0, %v1226_v49  ;;  %1184 = vmatpush3.msra.mxu1 %v1539_v36  ;;  %1185 = vmatprep.mubr.msk.f32.mxu1 %vm1398_vm0, %v1397_v1  ;;  %v117_v49 = vsel %vm103_vm1, %v115_v44, 0.0 }
 0x18b   :  { %1195 = vmatprep.subr.mxu1 %v1539_v36 }
 0x18c   :  { %1227 = vrcp.f32 %v310_v51  ;;  %v116_v51 = vmul.f32 %v1575_v53, %v1492_v7 }
 0x199   :  { %v1228_v41 = vpop.eup %1227 }
 0x19a   :  { %v313_v45 = vmul.f32 %v1228_v41, %v258_v20 }
 0x19c   :  { %v314_v52 = vadd.f32 %v1102_v15, %v313_v45 }
 0x19e   :  { %1186 = vmatmul.mubr.msk.f32.vlgmr.msra.gmra.mxu1 %vm601_vm5, %v314_v52  ;;  %v602_v54 = vsel %vm601_vm5, %v314_v52, 0.0  ;;  %v120_v52 = vsel %vm103_vm1, %v116_v51, 0.0 }
 0x19f   :  { %603 = vadd.xlane.f32.xlu1 %v602_v54  ;;  %1196 = vmatpush3.msra.mxu1 %v1539_v36 }
 0x1a3   :  { %606 = vadd.xlane.f32.xlu1 %v605_v50 }
 0x1a7   :  { %129 = vadd.xlane.f32.xlu1 %v128_v56 }
 0x1b2   :  { %1212 = vset.pattern.permute.xlu0 %v1399_v22 }
 0x1ba   :  { %611 = vadd.xlane.f32.xlu0 %v610_v33 }
 0x1be   :  { %126 = vadd.xlane.f32.xlu0 %v125_v59 }
 0x1fe   :  { %v615_v62 = vpop.xlane.xlu1 %614 }
 0x1ff   :  { %v617_v18 = vadd.f32 2.0, %v615_v62 }
 0x205   :  { %v864_v60 = vpop.trf.xlu0 }
 0x206   :  { %1197 = vmatprep.mubr.msk.f32.mxu1 %vm601_vm5, %v864_v60 }
 0x209   :  { %v865_v61 = vpop.trf.xlu0 }
 0x20a   :  { %1198 = vmatmul.mubr.msk.f32.vlgmr.msra.gmra.mxu1 %vm601_vm5, %v865_v61 }
 0x228   :  { %v604_v63 = vpop.xlane.xlu1 %603 }
 0x22c   :  { %v607_v4 = vpop.xlane.xlu1 %606 }
 0x22d   :  { %v608_v6 = vadd.f32 %v607_v4, %v604_v63 }
 0x22f   :  { %v609_v8 = vadd.f32 1.0, %v608_v6 }
 0x231   :  { %1229 = vrcp.f32 %v609_v8 }
 0x234   :  { %v1194_v21 = vpop.f32.mrf.mxu0 }
 0x23e   :  { %v1230_v13 = vpop.eup %1229 }
 0x243   :  { %v612_v19 = vpop.xlane.xlu0 %611 }
 0x244   :  { %v616_v20 = vadd.f32 2.0, %v612_v19 }
 0x249   :  { %v687_v0 = vpop.f32.mrf.mxu1 }
 0x24b   :  { %v1182_v5 = vpop.f32.mrf.mxu1 }
 0x25e   :  { %v760_v22 = vpop.f32.mrf.mxu1 }
 0x25f   :  { %v761_v9 = vadd.f32 %v760_v22, %v687_v0 }
 0x260   :  { %v1187_v10 = vpop.f32.mrf.mxu1 }
 0x261   :  { %v764_v11 = vadd.f32 %v761_v9, %v1539_v36  ;;  %v839_v36 = vpop.f32.mrf.mxu0 }
 0x263   :  { %v766_v15 = vmul.f32 %v1230_v13, %v764_v11 }
 0x265   :  { %v973_v16 = vadd.f32 %v1117_v14, %v766_v15 }
 0x267   :  { %1231 = vtanh.f32 %v973_v16 }
 0x268   :  { %1233 = vrcp.f32 %v617_v18 }
 0x269   :  { %1235 = vrcp.f32 %v616_v20 }
 0x274   :  { %v1232_v17 = vpop.eup %1231 }
 0x275   :  { %979 = vst.msk [vmem:[#allocation12] sm:$0xff] %vm103_vm1, %v1232_v17  ;;  %v1234_v30 = vpop.eup %1233  ;;  %v1026_v54 = vmul.f32 %v1232_v17, %v1484_v3 }
 0x276   :  { %v1236_v33 = vpop.eup %1235 }
 0x277   :  { %v1027_v56 = vsel %vm103_vm1, %v1026_v54, 0.0 }
 0x2ca   :  { %v1199_v23 = vpop.f32.mrf.mxu1 }
 0x2cb   :  { %v958_v25 = vadd.f32 %v1199_v23, %v1194_v21 }
 0x2cc   :  { %v952_v26 = vpop.f32.mrf.mxu1 }
 0x2cd   :  { %v962_v28 = vadd.f32 %v1532_v34, %v958_v25  ;;  %v953_v29 = vadd.f32 %v952_v26, %v839_v36 }
 0x2cf   :  { %v966_v31 = vmul.f32 %v1234_v30, %v962_v28  ;;  %v961_v32 = vadd.f32 %v953_v29, %v1536_v35  ;;  %v1030_v35 = vmul.f32 %v1232_v17, %v1232_v17 }
 0x2d1   :  { %v976_v37 = vadd.f32 %v1117_v14, %v966_v31  ;;  %v965_v38 = vmul.f32 %v1236_v33, %v961_v32  ;;  %v1031_v41 = vsel %vm103_vm1, %v1030_v35, 0.0 }
 0x2d3   :  { %1237 = vtanh.f32 %v976_v37  ;;  %v975_v39 = vadd.f32 %v1117_v14, %v965_v38 }
 0x2d5   :  { %1239 = vtanh.f32 %v975_v39 }
 0x2e0   :  { %v1238_v42 = vpop.eup %1237 }
 0x2e1   :  { %v989_v43 = vmul.f32 %v1238_v42, %v1238_v42  ;;  %v981_v55 = vmul.f32 %v1238_v42, %v1492_v7 }
 0x2e2   :  { %v1240_v46 = vpop.eup %1239 }
 0x2e3   :  { %v993_v47 = vsel %vm103_vm1, %v989_v43, 0.0  ;;  %v988_v48 = vmul.f32 %v1240_v46, %v1240_v46  ;;  %v980_v50 = vmul.f32 %v1240_v46, %v1482_v2  ;;  %v985_v2 = vsel %vm103_vm1, %v981_v55, 0.0 }
 0x2e4   :  { %994 = vadd.xlane.f32.xlu1 %v993_v47 }
 0x2e5   :  { %v990_v34 = vsel %vm103_vm1, %v988_v48, 0.0  ;;  %v982_v45 = vsel %vm103_vm1, %v980_v50, 0.0 }
 0x2e6   :  { %991 = vadd.xlane.f32.xlu0 %v990_v34 }
 0x2e8   :  { %118 = vadd.xlane.f32.xlu1 %v117_v49 }
 0x2ea   :  { %1032 = vadd.xlane.f32.xlu0 %v1031_v41 }
 0x2ec   :  { %983 = vadd.xlane.f32.xlu1 %v982_v45 }
 0x2ee   :  { %121 = vadd.xlane.f32.xlu0 %v120_v52 }
 0x2f0   :  { %1028 = vadd.xlane.f32.xlu1 %v1027_v56 }
 0x2f2   :  { %986 = vadd.xlane.f32.xlu0 %v985_v2 }
 0x2f3   :  { %1352 = shalt.err (!%p1349_p10)
}
 0x2f4   :  { %1076 = dma.vmem_to_hbm [thread:$0]  %s1074_s11, 128, %s1633_s8, [#allocation6]   ;;  %v130_v3 = vpop.xlane.xlu1 %129  ;;  %v127_v7 = vpop.xlane.xlu0 %126  ;;  %vm1052_vm0 = vcmp.eq.s32.totalorder %v1557_v12, 0  ;;  %vm1056_vm1 = vcmp.eq.s32.totalorder %v1557_v12, 1  ;;  %vm1061_vm2 = vcmp.eq.s32.totalorder %v1557_v12, 2 }
 0x2f5   :  { %v132_v53 = vmul.f32 %v130_v3, %v1529_v27  ;;  %v131_v57 = vmul.f32 %v127_v7, %v1526_v24  ;;  %s1401_s8 = smov [#allocation13]  }
 0x2f6   :  { %s1083_s15 = sshll.u32 %s1401_s8, 4  ;;  %s1084_s15 = int_to_ptr.vmem [resolvable:$true] %s1083_s15 }
 0x2f7   :  { %1241 = vrsqrt.f32 %v132_v53  ;;  %vm142_vm6 = vcmp.eq.f32.partialorder %v132_v53, inf  ;;  %vm135_vm7 = vcmp.eq.f32.partialorder %v131_v57, inf  ;;  %v145_v63 = vand.u32 2147483648, %v132_v53  ;;  %s1361_s5 = scalar_lea.vmem %s1084_s15, 16  ;;  %s1365_s16 = scalar_lea.vmem %s1084_s15, 32 }
 0x2f8   :  { %1243 = vrsqrt.f32 %v131_v57  ;;  %v138_v4 = vand.u32 2147483648, %v131_v57  ;;  %vm144_vm8 = vcmp.eq.f32.partialorder %v132_v53, 0.0  ;;  %vm137_vm9 = vcmp.eq.f32.partialorder %v131_v57, 0.0  ;;  %p1362_p11 = scmp.ne.s32.totalorder %s1084_s15, %s1361_s5  ;;  %p1366_p12 = scmp.lt.s32.totalorder %s1084_s15, %s1084_s15 }
 0x2f9   :  { %p1367_p13 = scmp.lt.s32.totalorder %s1365_s16, %s1361_s5 }
 0x2fb   :  { %p1368_p0 = por %p1367_p13, %p1366_p12 }
 0x2fd   :  { %p1369_p1 = pnand %p1368_p0, %p1362_p11 }
 0x304   :  { %v1242_v58 = vpop.eup %1241 }
 0x305   :  { %v1244_v59 = vpop.eup %1243  ;;  %v141_v60 = vmul.f32 %v1242_v58, %v132_v53 }
 0x306   :  { %v134_v61 = vmul.f32 %v1244_v59, %v131_v57 }
 0x307   :  { %v143_v62 = vsel %vm142_vm6, %v132_v53, %v141_v60 }
 0x308   :  { %v136_v0 = vsel %vm135_vm7, %v131_v57, %v134_v61  ;;  %v146_v6 = vsel %vm144_vm8, %v145_v63, %v143_v62 }
 0x309   :  { %v139_v22 = vsel %vm137_vm9, %v138_v4, %v136_v0  ;;  %v148_v11 = vmax.f32 %v146_v6, 1e-08  ;;  %v1118_v6 = vsel %vm1052_vm0, 1.0, %v1397_v1 }
 0x30a   :  { %v147_v13 = vmax.f32 %v139_v22, 1e-08 }
 0x36d   :  { %v995_v5 = vpop.xlane.xlu1 %994 }
 0x36e   :  { %v997_v8 = vmul.f32 %v995_v5, %v1529_v27 }
 0x36f   :  { %v992_v9 = vpop.xlane.xlu0 %991 }
 0x370   :  { %1245 = vrsqrt.f32 %v997_v8  ;;  %v996_v10 = vmul.f32 %v992_v9, %v1526_v24  ;;  %vm1007_vm10 = vcmp.eq.f32.partialorder %v997_v8, inf  ;;  %v1010_v19 = vand.u32 2147483648, %v997_v8 }
 0x371   :  { %vm1009_vm11 = vcmp.eq.f32.partialorder %v997_v8, 0.0  ;;  %v119_v25 = vpop.xlane.xlu1 %118 }
 0x372   :  { %1247 = vrsqrt.f32 %v996_v10  ;;  %vm1000_vm12 = vcmp.eq.f32.partialorder %v996_v10, inf  ;;  %v1003_v24 = vand.u32 2147483648, %v996_v10  ;;  %vm1002_vm13 = vcmp.eq.f32.partialorder %v996_v10, 0.0 }
 0x373   :  { %v1033_v14 = vpop.xlane.xlu0 %1032  ;;  %1249 = vrcp.f32 %v148_v11 }
 0x374   :  { %v1034_v15 = vmul.f32 %v1033_v14, %v1546_v40  ;;  %1251 = vrcp.f32 %v147_v13 }
 0x375   :  { %v984_v34 = vpop.xlane.xlu1 %983 }
 0x376   :  { %1253 = vrsqrt.f32 %v1034_v15  ;;  %vm1037_vm14 = vcmp.eq.f32.partialorder %v1034_v15, inf  ;;  %v1040_v38 = vand.u32 2147483648, %v1034_v15  ;;  %vm1039_vm15 = vcmp.eq.f32.partialorder %v1034_v15, 0.0 }
 0x377   :  { %v122_v27 = vpop.xlane.xlu0 %121 }
 0x379   :  { %v1029_v55 = vpop.xlane.xlu1 %1028 }
 0x37b   :  { %v987_v50 = vpop.xlane.xlu0 %986 }
 0x37d   :  { %v1246_v16 = vpop.eup %1245 }
 0x37e   :  { %v1006_v17 = vmul.f32 %v1246_v16, %v997_v8 }
 0x37f   :  { %v1248_v18 = vpop.eup %1247 }
 0x380   :  { %v999_v20 = vmul.f32 %v1248_v18, %v996_v10  ;;  %v1008_v21 = vsel %vm1007_vm10, %v997_v8, %v1006_v17  ;;  %v1250_v23 = vpop.eup %1249  ;;  %v1119_v8 = vsel %vm1056_vm1, 1.0, %v1397_v1 }
 0x381   :  { %v1011_v36 = vsel %vm1009_vm11, %v1010_v19, %v1008_v21  ;;  %v1252_v26 = vpop.eup %1251  ;;  %v152_v40 = vmul.f32 %v1250_v23, %v122_v27 }
 0x382   :  { %v1001_v28 = vsel %vm1000_vm12, %v996_v10, %v999_v20  ;;  %v1013_v29 = vmax.f32 %v1011_v36, 1e-08  ;;  %v151_v32 = vmul.f32 %v1252_v26, %v119_v25  ;;  %v1120_v10 = vsel %vm1061_vm2, 1.0, %v1397_v1 }
 0x383   :  { %v1254_v30 = vpop.eup %1253  ;;  %v1004_v31 = vsel %vm1002_vm13, %v1003_v24, %v1001_v28 }
 0x384   :  { %v1036_v33 = vmul.f32 %v1254_v30, %v1034_v15  ;;  %v1012_v37 = vmax.f32 %v1004_v31, 1e-08  ;;  %1255 = vrcp.f32 %v1013_v29  ;;  %v153_v39 = vadd.f32 %v152_v40, %v151_v32 }
 0x386   :  { %1257 = vrcp.f32 %v1012_v37  ;;  %v1038_v42 = vsel %vm1037_vm14, %v1034_v15, %v1036_v33  ;;  %v154_v46 = vrot.slane %v153_v39, 4 }
 0x387   :  { %v1041_v43 = vsel %vm1039_vm15, %v1040_v38, %v1038_v42 }
 0x388   :  { %v1042_v44 = vmax.f32 %v1041_v43, 1e-08  ;;  %v155_v47 = vadd.f32 %v154_v46, %v153_v39 }
 0x38a   :  { %1259 = vrcp.f32 %v1042_v44  ;;  %v156_v49 = vrot.slane %v155_v47, 2 }
 0x38c   :  { %v157_v45 = vadd.f32 %v156_v49, %v155_v47 }
 0x38e   :  { %v158_v3 = vrot.slane %v157_v45, 1 }
 0x390   :  { %v159_v59 = vadd.f32 %v158_v3, %v157_v45 }
 0x391   :  { %v1256_v48 = vpop.eup %1255 }
 0x392   :  { %v1017_v41 = vmul.f32 %v1256_v48, %v987_v50  ;;  %v160_v0 = vmul.f32 0.0625, %v159_v59 }
 0x393   :  { %v1258_v35 = vpop.eup %1257 }
 0x394   :  { %v1016_v51 = vmul.f32 %v1258_v35, %v984_v34  ;;  %v1055_v13 = vmul.f32 %v1118_v6, %v160_v0 }
 0x396   :  { %v1018_v52 = vadd.f32 %v1017_v41, %v1016_v51 }
 0x397   :  { %v1260_v54 = vpop.eup %1259 }
 0x398   :  { %v1044_v56 = vmul.f32 %v1260_v54, %v1029_v55  ;;  %v1019_v2 = vrot.slane %v1018_v52, 4 }
 0x39a   :  { %v1045_v7 = vrot.slane %v1044_v56, 4  ;;  %v1020_v53 = vadd.f32 %v1019_v2, %v1018_v52 }
 0x39c   :  { %v1046_v57 = vadd.f32 %v1045_v7, %v1044_v56  ;;  %v1021_v58 = vrot.slane %v1020_v53, 2 }
 0x39e   :  { %v1047_v60 = vrot.slane %v1046_v57, 2  ;;  %v1022_v61 = vadd.f32 %v1021_v58, %v1020_v53 }
 0x3a0   :  { %v1048_v62 = vadd.f32 %v1047_v60, %v1046_v57  ;;  %v1023_v63 = vrot.slane %v1022_v61, 1 }
 0x3a2   :  { %v1049_v4 = vrot.slane %v1048_v62, 1  ;;  %v1024_v5 = vadd.f32 %v1023_v63, %v1022_v61 }
 0x3a4   :  { %v1050_v22 = vadd.f32 %v1049_v4, %v1048_v62  ;;  %v1025_v9 = vmul.f32 0.0625, %v1024_v5 }
 0x3a6   :  { %v1051_v11 = vmul.f32 0.125, %v1050_v22  ;;  %v1059_v14 = vmul.f32 %v1119_v8, %v1025_v9 }
 0x3a8   :  { %v1060_v15 = vadd.f32 %v1059_v14, %v1055_v13  ;;  %v1064_v16 = vmul.f32 %v1120_v10, %v1051_v11 }
 0x3aa   :  { %v1065_v17 = vadd.f32 %v1064_v16, %v1060_v15 }
 0x3ac   :  { %1066 = vst [vmem:[#allocation13] sm:$0x1] %v1065_v17 }
 0x3ad   :  { %1372 = shalt.err (!%p1369_p1)
}
 0x3ae   :  { %1086 = dma.vmem_to_hbm [thread:$0]  %s1084_s15, 16, %s1634_s9, [#allocation14]  }
 0x3af   :  { %1387 = dma.done.wait [#allocation6], 128  }
 0x3b0   :  { %1388 = vsyncadd [#allocation6], 4294967168 }
 0x3b1   :  { %1389 = dma.done.wait [#allocation14], 16  }
 0x3b2   :  { %1390 = vsyncadd [#allocation14], 4294967280 }
 0x3b3   :  { %1093 = vsyncpa [#allocation5], 1 }
 0x3b4   :  { %1094 = vsyncpa [#allocation8], 1 }
 0x3b5   :  { %1095 = vsyncpa [#allocation11], 1 }
 0x3b6   :  { %1096 = vsyncpa [#allocation6], 1 }
 0x3b7   :  { %1097 = vsyncpa [#allocation14], 1 }

</bundles_post_ra>
